<compile_context>
chip_gen: v6e
topology: v6e:2x2x1
jax: 0.10.0
libtpu: 0.0.40
codegen_flags: <defaults>
</compile_context>

<pallas_src>
import jax
import jax.numpy as jnp
from jax.experimental import pallas as pl
from jax.experimental.pallas import tpu as pltpu

K_IN = 14 * 14    # 196 true contraction dim
K_PAD = 256       # 196 -> 256 aligned contraction dim
H1 = 128
H2 = 64
N_OUT = 10
OUT_PAD = 128     # 10 -> 128 lane-dense output dim
BM_MAX = 2048     # batch tile (double-buffered x tile ~4 MiB f32)


def _round_up(a, m):
    return ((a + m - 1) // m) * m


def mlp_kernel(x_ref, w1_ref, b1_ref, w2_ref, b2_ref, w3_ref, b3_ref, o_ref):
    # One batch tile per grid step; all three matmuls on the MXU with f32
    # accumulation, bias add + ReLU on the VPU. No intermediate HBM traffic.
    x = x_ref[...]
    h1 = jnp.dot(x, w1_ref[...], preferred_element_type=jnp.float32) + b1_ref[...]
    h1 = jnp.maximum(h1, 0.0)
    h2 = jnp.dot(h1, w2_ref[...], preferred_element_type=jnp.float32) + b2_ref[...]
    h2 = jnp.maximum(h2, 0.0)
    o_ref[...] = jnp.dot(h2, w3_ref[...], preferred_element_type=jnp.float32) + b3_ref[...]


def net_forward(x, params):
    """x: any shape reshapeable to (-1, 196), f32. Returns (B, 10) logits."""
    w1, b1, w2, b2, w3, b3 = params
    x2d = x.reshape(-1, K_IN).astype(jnp.float32)
    B = x2d.shape[0]

    # --- wrapper-side padding for alignment ------------------------------
    # Contraction dim 196 -> 256 (zero pad x cols and w1 rows: exact).
    x_p = jnp.pad(x2d, ((0, 0), (0, K_PAD - K_IN)))
    w1_p = jnp.pad(w1, ((0, K_PAD - K_IN), (0, 0)))
    # Output dim 10 -> 128 (zero pad w3 cols and b3: padded logits are junk
    # but sliced away below).
    w3_p = jnp.pad(w3, ((0, 0), (0, OUT_PAD - N_OUT)))
    b3_p = jnp.pad(b3, ((0, 0), (0, OUT_PAD - N_OUT)))

    # Batch tiling: tile rows must be a multiple of 8 for the (8,128) layout
    # constraint; pad B up to a multiple of the tile.
    BM = min(BM_MAX, _round_up(B, 8))
    Bp = _round_up(B, BM)
    if Bp != B:
        x_p = jnp.pad(x_p, ((0, Bp - B), (0, 0)))
    grid = (Bp // BM,)

    # Advisory cost hint for XLA's scheduler around the custom call.
    flops = 2 * Bp * (K_PAD * H1 + H1 * H2 + H2 * OUT_PAD)
    bytes_accessed = 4 * (
        Bp * K_PAD + Bp * OUT_PAD
        + K_PAD * H1 + H1 + H1 * H2 + H2 + H2 * OUT_PAD + OUT_PAD
    )
    cost = pl.CostEstimate(flops=flops, transcendentals=0,
                           bytes_accessed=bytes_accessed)

    resident = lambda shape: pl.BlockSpec(shape, lambda i: (0, 0))
    out = pl.pallas_call(
        mlp_kernel,
        out_shape=jax.ShapeDtypeStruct((Bp, OUT_PAD), jnp.float32),
        grid=grid,
        in_specs=[
            pl.BlockSpec((BM, K_PAD), lambda i: (i, 0)),   # x: streamed per tile
            resident((K_PAD, H1)),                         # w1 resident in VMEM
            resident((1, H1)),                             # b1
            resident((H1, H2)),                            # w2
            resident((1, H2)),                             # b2
            resident((H2, OUT_PAD)),                       # w3 (lane-dense out)
            resident((1, OUT_PAD)),                        # b3
        ],
        out_specs=pl.BlockSpec((BM, OUT_PAD), lambda i: (i, 0)),
        compiler_params=pltpu.CompilerParams(
            dimension_semantics=("parallel",),             # both TCs on v7x
        ),
        cost_estimate=cost,
    )(x_p, w1_p, b1, w2, b2, w3_p, b3_p)

    return out[:B, :N_OUT]


def init_params(key):
    """Deterministic init mirroring PyTorch Linear shapes.

    PyTorch stores weight as (out, in); we store the transpose (in, out) so
    the kernel does x @ W. Biases kept 2-D (1, out) for TPU broadcasting.
    """
    dims = [(K_IN, H1), (H1, H2), (H2, N_OUT)]
    params = []
    for i, (fin, fout) in enumerate(dims):
        kw, kb = jax.random.split(jax.random.fold_in(key, i))
        bound = 1.0 / (fin ** 0.5)  # same scale as torch's default uniform init
        w = jax.random.uniform(kw, (fin, fout), jnp.float32, -bound, bound)
        b = jax.random.uniform(kb, (1, fout), jnp.float32, -bound, bound)
        params.extend([w, b])
    return tuple(params)


def reference_forward(x, params):
    w1, b1, w2, b2, w3, b3 = params
    x2d = x.reshape(-1, K_IN).astype(jnp.float32)
    h1 = jnp.maximum(x2d @ w1 + b1, 0.0)
    h2 = jnp.maximum(h1 @ w2 + b2, 0.0)
    return h2 @ w3 + b3


if __name__ == "__main__":
    key = jax.random.PRNGKey(0)
    params = init_params(key)

    # Small MNIST-like batch: (B=8, C=1, H=14, W=14), NCHW like PyTorch.
    x = jax.random.normal(jax.random.fold_in(key, 99), (8, 1, 14, 14), jnp.float32)

    out = net_forward(x, params)
    out = jax.block_until_ready(out)

    ref = reference_forward(x, params)
    assert out.shape == (8, 10), out.shape
    assert jnp.allclose(out, ref, atol=1e-4, rtol=1e-4), "mismatch vs. JAX reference"

    print("KERNEL_OK")
</pallas_src>

<mosaic_0001>
module attributes {stable_mosaic.version = 11 : i64} {
  func.func @mlp_kernel(%arg0: i32, %arg1: memref<8x256xf32, #tpu.memory_space<vmem>>, %arg2: memref<256x128xf32, #tpu.memory_space<vmem>>, %arg3: memref<1x128xf32, #tpu.memory_space<vmem>>, %arg4: memref<128x64xf32, #tpu.memory_space<vmem>>, %arg5: memref<1x64xf32, #tpu.memory_space<vmem>>, %arg6: memref<64x128xf32, #tpu.memory_space<vmem>>, %arg7: memref<1x128xf32, #tpu.memory_space<vmem>>, %arg8: memref<8x128xf32, #tpu.memory_space<vmem>>) attributes {dimension_semantics = [#tpu.dimension_semantics<parallel>], iteration_bounds = array<i64: 1>, scalar_prefetch = 0 : i64, scratch_operands = 0 : i64, tpu.core_type = #tpu.core_type<tc>, window_params = [{transform_indices = @transform_0, window_bounds = array<i64: 8, 256>}, {pipeline_mode = #tpu.pipeline_mode<synchronous>, transform_indices = @transform_1, window_bounds = array<i64: 256, 128>}, {pipeline_mode = #tpu.pipeline_mode<synchronous>, transform_indices = @transform_2, window_bounds = array<i64: 1, 128>}, {pipeline_mode = #tpu.pipeline_mode<synchronous>, transform_indices = @transform_3, window_bounds = array<i64: 128, 64>}, {pipeline_mode = #tpu.pipeline_mode<synchronous>, transform_indices = @transform_4, window_bounds = array<i64: 1, 64>}, {pipeline_mode = #tpu.pipeline_mode<synchronous>, transform_indices = @transform_5, window_bounds = array<i64: 64, 128>}, {pipeline_mode = #tpu.pipeline_mode<synchronous>, transform_indices = @transform_6, window_bounds = array<i64: 1, 128>}, {transform_indices = @transform_7, window_bounds = array<i64: 8, 128>}]} {
    %c0 = arith.constant 0 : index
    %c0_0 = arith.constant 0 : index
    %0 = vector.load %arg1[%c0, %c0_0] : memref<8x256xf32, #tpu.memory_space<vmem>>, vector<8x256xf32>
    %c0_1 = arith.constant 0 : index
    %c0_2 = arith.constant 0 : index
    %1 = vector.load %arg2[%c0_1, %c0_2] : memref<256x128xf32, #tpu.memory_space<vmem>>, vector<256x128xf32>
    %cst = arith.constant dense<0.000000e+00> : vector<8x128xf32>
    %2 = tpu.matmul %0, %1, %cst {dimension_numbers = #tpu.dot_dimension_numbers<[1], [0], [0], [1], [0, 0, 1, 1], [], []>} : vector<8x256xf32>, vector<256x128xf32>, vector<8x128xf32> -> vector<8x128xf32>
    %c0_3 = arith.constant 0 : index
    %c0_4 = arith.constant 0 : index
    %3 = vector.load %arg3[%c0_3, %c0_4] : memref<1x128xf32, #tpu.memory_space<vmem>>, vector<1x128xf32>
    %4 = vector.broadcast %3 : vector<1x128xf32> to vector<8x128xf32>
    %5 = arith.addf %2, %4 : vector<8x128xf32>
    %cst_5 = arith.constant 0.000000e+00 : f32
    %6 = vector.broadcast %cst_5 : f32 to vector<8x128xf32>
    %7 = arith.maximumf %5, %6 : vector<8x128xf32>
    %c0_6 = arith.constant 0 : index
    %c0_7 = arith.constant 0 : index
    %8 = vector.load %arg4[%c0_6, %c0_7] : memref<128x64xf32, #tpu.memory_space<vmem>>, vector<128x64xf32>
    %cst_8 = arith.constant dense<0.000000e+00> : vector<8x64xf32>
    %9 = tpu.matmul %7, %8, %cst_8 {dimension_numbers = #tpu.dot_dimension_numbers<[1], [0], [0], [1], [0, 0, 1, 1], [], []>} : vector<8x128xf32>, vector<128x64xf32>, vector<8x64xf32> -> vector<8x64xf32>
    %c0_9 = arith.constant 0 : index
    %c0_10 = arith.constant 0 : index
    %10 = vector.load %arg5[%c0_9, %c0_10] : memref<1x64xf32, #tpu.memory_space<vmem>>, vector<1x64xf32>
    %11 = vector.broadcast %10 : vector<1x64xf32> to vector<8x64xf32>
    %12 = arith.addf %9, %11 : vector<8x64xf32>
    %cst_11 = arith.constant 0.000000e+00 : f32
    %13 = vector.broadcast %cst_11 : f32 to vector<8x64xf32>
    %14 = arith.maximumf %12, %13 : vector<8x64xf32>
    %c0_12 = arith.constant 0 : index
    %c0_13 = arith.constant 0 : index
    %15 = vector.load %arg6[%c0_12, %c0_13] : memref<64x128xf32, #tpu.memory_space<vmem>>, vector<64x128xf32>
    %cst_14 = arith.constant dense<0.000000e+00> : vector<8x128xf32>
    %16 = tpu.matmul %14, %15, %cst_14 {dimension_numbers = #tpu.dot_dimension_numbers<[1], [0], [0], [1], [0, 0, 1, 1], [], []>} : vector<8x64xf32>, vector<64x128xf32>, vector<8x128xf32> -> vector<8x128xf32>
    %c0_15 = arith.constant 0 : index
    %c0_16 = arith.constant 0 : index
    %17 = vector.load %arg7[%c0_15, %c0_16] : memref<1x128xf32, #tpu.memory_space<vmem>>, vector<1x128xf32>
    %18 = vector.broadcast %17 : vector<1x128xf32> to vector<8x128xf32>
    %19 = arith.addf %16, %18 : vector<8x128xf32>
    %c0_17 = arith.constant 0 : index
    %c0_18 = arith.constant 0 : index
    %20 = vector.load %arg8[%c0_17, %c0_18] : memref<8x128xf32, #tpu.memory_space<vmem>>, vector<8x128xf32>
    tpu.vector_store %arg8[%c0_17, %c0_18], %19 {strides = array<i32>} : memref<8x128xf32, #tpu.memory_space<vmem>>, vector<8x128xf32>,
    return
  }
  func.func @transform_0(%arg0: i32) -> (i32, i32) {
    %c0_i32 = arith.constant 0 : i32
    %c0_i32_0 = arith.constant 0 : i32
    return %arg0, %c0_i32 : i32, i32
  }
  func.func @transform_1(%arg0: i32) -> (i32, i32) {
    %c0_i32 = arith.constant 0 : i32
    %c0_i32_0 = arith.constant 0 : i32
    %c0_i32_1 = arith.constant 0 : i32
    return %c0_i32, %c0_i32_0 : i32, i32
  }
  func.func @transform_2(%arg0: i32) -> (i32, i32) {
    %c0_i32 = arith.constant 0 : i32
    %c0_i32_0 = arith.constant 0 : i32
    %c0_i32_1 = arith.constant 0 : i32
    return %c0_i32, %c0_i32_0 : i32, i32
  }
  func.func @transform_3(%arg0: i32) -> (i32, i32) {
    %c0_i32 = arith.constant 0 : i32
    %c0_i32_0 = arith.constant 0 : i32
    %c0_i32_1 = arith.constant 0 : i32
    return %c0_i32, %c0_i32_0 : i32, i32
  }
  func.func @transform_4(%arg0: i32) -> (i32, i32) {
    %c0_i32 = arith.constant 0 : i32
    %c0_i32_0 = arith.constant 0 : i32
    %c0_i32_1 = arith.constant 0 : i32
    return %c0_i32, %c0_i32_0 : i32, i32
  }
  func.func @transform_5(%arg0: i32) -> (i32, i32) {
    %c0_i32 = arith.constant 0 : i32
    %c0_i32_0 = arith.constant 0 : i32
    %c0_i32_1 = arith.constant 0 : i32
    return %c0_i32, %c0_i32_0 : i32, i32
  }
  func.func @transform_6(%arg0: i32) -> (i32, i32) {
    %c0_i32 = arith.constant 0 : i32
    %c0_i32_0 = arith.constant 0 : i32
    %c0_i32_1 = arith.constant 0 : i32
    return %c0_i32, %c0_i32_0 : i32, i32
  }
  func.func @transform_7(%arg0: i32) -> (i32, i32) {
    %c0_i32 = arith.constant 0 : i32
    %c0_i32_0 = arith.constant 0 : i32
    return %arg0, %c0_i32 : i32, i32
  }
}

</mosaic_0001>

<bundles_post_ra>
// kernel: tpu_custom_call.1
= control target key start
LH: loop header
LB: loop body
LE: loop exit
PB: predicated region body
PF: predicated region fallthrough
CT: control target
= control target key end

     0   :  { %12 = vsyncpa [#allocation3], 0  ;;  %s686_s0 = inlined_call_operand.vmem [shape: f32[8,256], index: 0, kind: input, shape index: {}]   ;;  %s687_s1 = inlined_call_operand.hbm [shape: f32[256,128], index: 1, kind: input, shape index: {}]   ;;  %s688_s2 = inlined_call_operand.vmem [shape: f32[1,128], index: 2, kind: input, shape index: {}]   ;;  %s689_s3 = inlined_call_operand.vmem [shape: f32[128,64], index: 3, kind: input, shape index: {}]   ;;  %s690_s4 = inlined_call_operand.vmem [shape: f32[1,64], index: 4, kind: input, shape index: {}]   ;;  %s691_s5 = inlined_call_operand.vmem [shape: f32[64,128], index: 5, kind: input, shape index: {}]   ;;  %s692_s6 = inlined_call_operand.vmem [shape: f32[1,128], index: 6, kind: input, shape index: {}]   ;;  %s693_s7 = inlined_call_operand.hbm [shape: f32[8,128], index: 7, kind: output, shape index: {}]  }
   0x1   :  { %13 = vsyncpa [#allocation4], 0  ;;  %s521_s24 = smov [#allocation2]  }
   0x2   :  { %s21_s25 = sshll.u32 %s521_s24, 4  ;;  %s22_s25 = int_to_ptr.vmem [resolvable:$true] %s21_s25 }
   0x3   :  { %s485_s26 = scalar_lea.vmem %s22_s25, 4096  ;;  %p490_p1 = scmp.lt.s32.totalorder %s22_s25, %s22_s25 }
   0x4   :  { %p486_p0 = scmp.ne.s32.totalorder %s22_s25, %s485_s26  ;;  %p491_p2 = scmp.lt.s32.totalorder %s485_s26, %s485_s26 }
   0x6   :  { %p492_p3 = por %p491_p2, %p490_p1 }
   0x8   :  { %p493_p4 = pnand %p492_p3, %p486_p0 }
   0xa   :  { %496 = shalt.err (!%p493_p4)
}
   0xb   :  { %s522_s27 = smov 128   ;;  %s523_s28 = smov 8  }
   0xc   :  { %27 = dma.hbm_to_vmem [thread:$0]  %s687_s1, 4096, %s22_s25, [#allocation3], %s522_s27, %s522_s27, %s523_s28  }
   0xd   :  { %517 = dma.done.wait [#allocation3], 4096  }
   0xe   :  { %518 = vsyncadd [#allocation3], 4294963200  ;;  %v524_v0 = vmov 0.0   ;;  %v74_v1 = vld [vmem:[#allocation2 + $0xf8] sm:$0xff]  ;;  %v73_v3 = vld [vmem:[#allocation2 + $0xf0] sm:$0xff]  ;;  %vm525_vm0 = vmmov 0  }
   0xf   :  { %417 = vmatprep.subr.mxu1 %v524_v0  ;;  %v58_v2 = vld [vmem:[#allocation2 + $0x78] sm:$0xff]  ;;  %356 = vmatprep.subr.mxu0 %v74_v1  ;;  %v57_v4 = vld [vmem:[#allocation2 + $0x70] sm:$0xff]  ;;  %v72_v5 = vld [vmem:[#allocation2 + $0xe8] sm:$0xff]  ;;  %vm262_vm1 = vcmask 523264   ;;  %s526_s13 = smov [#allocation5]  }
  0x10   :  { %357 = vmatpush3.msra.mxu0 %v58_v2  ;;  %v56_v6 = vld [vmem:[#allocation2 + $0x68] sm:$0xff]  ;;  %v71_v7 = vld [vmem:[#allocation2 + $0xe0] sm:$0xff]  ;;  %v70_v9 = vld [vmem:[#allocation2 + $0xd8] sm:$0xff]  ;;  %449 = vmatprep.mubr.msk.f32.mxu1 %vm525_vm0, %v524_v0  ;;  %s343_s14 = sshll.u32 %s526_s13, 4  ;;  %s344_s14 = int_to_ptr.vmem [resolvable:$true] %s343_s14 }
  0x11   :  { %358 = vmatprep.subr.mxu0 %v73_v3  ;;  %v55_v8 = vld [vmem:[#allocation2 + $0x60] sm:$0xff]  ;;  %v54_v10 = vld [vmem:[#allocation2 + $0x58] sm:$0xff]  ;;  %v69_v11 = vld [vmem:[#allocation2 + $0xd0] sm:$0xff]  ;;  %p502_p6 = scmp.lt.s32.totalorder %s344_s14, %s344_s14 }
  0x12   :  { %359 = vmatpush3.msra.mxu0 %v57_v4  ;;  %v53_v12 = vld [vmem:[#allocation2 + $0x50] sm:$0xff]  ;;  %v68_v13 = vld [vmem:[#allocation2 + $0xc8] sm:$0xff]  ;;  %v168_v16 = vld [vmem:[%s689_s3 + $0x78] sm:$0xff] }
  0x13   :  { %360 = vmatprep.subr.mxu0 %v72_v5  ;;  %v42_v14 = vld [vmem:[%s686_s0 + $0x8] sm:$0xff]  ;;  %v167_v17 = vld [vmem:[%s689_s3 + $0x70] sm:$0xff]  ;;  %v67_v18 = vld [vmem:[#allocation2 + $0xc0] sm:$0xff]  ;;  %418 = vmatpush3.msra.mxu1 %v168_v16 }
  0x14   :  { %361 = vmatpush3.msra.mxu0 %v56_v6  ;;  %v52_v15 = vld [vmem:[#allocation2 + $0x48] sm:$0xff]  ;;  %146 = vmatprep.mubr.f32.mxu0 %v42_v14  ;;  %v51_v19 = vld [vmem:[#allocation2 + $0x40] sm:$0xff]  ;;  %v66_v21 = vld [vmem:[#allocation2 + $0xb8] sm:$0xff] }
  0x15   :  { %362 = vmatprep.subr.mxu0 %v71_v7  ;;  %419 = vmatprep.subr.mxu1 %v524_v0  ;;  %v166_v20 = vld [vmem:[%s689_s3 + $0x68] sm:$0xff]  ;;  %v50_v22 = vld [vmem:[#allocation2 + $0x38] sm:$0xff]  ;;  %v165_v23 = vld [vmem:[%s689_s3 + $0x60] sm:$0xff] }
  0x16   :  { %363 = vmatpush3.msra.mxu0 %v55_v8  ;;  %420 = vmatpush3.msra.mxu1 %v167_v17  ;;  %v65_v24 = vld [vmem:[#allocation2 + $0xb0] sm:$0xff]  ;;  %v164_v26 = vld [vmem:[%s689_s3 + $0x58] sm:$0xff]  ;;  %v64_v27 = vld [vmem:[#allocation2 + $0xa8] sm:$0xff] }
  0x17   :  { %364 = vmatprep.subr.mxu0 %v70_v9  ;;  %421 = vmatprep.subr.mxu1 %v524_v0  ;;  %v49_v25 = vld [vmem:[#allocation2 + $0x30] sm:$0xff]  ;;  %v48_v28 = vld [vmem:[#allocation2 + $0x28] sm:$0xff]  ;;  %v63_v30 = vld [vmem:[#allocation2 + $0xa0] sm:$0xff] }
  0x18   :  { %365 = vmatpush3.msra.mxu0 %v54_v10  ;;  %422 = vmatpush3.msra.mxu1 %v166_v20  ;;  %v163_v29 = vld [vmem:[%s689_s3 + $0x50] sm:$0xff]  ;;  %v47_v31 = vld [vmem:[#allocation2 + $0x20] sm:$0xff]  ;;  %v162_v32 = vld [vmem:[%s689_s3 + $0x48] sm:$0xff] }
  0x19   :  { %366 = vmatprep.subr.mxu0 %v69_v11  ;;  %423 = vmatprep.subr.mxu1 %v524_v0  ;;  %v62_v33 = vld [vmem:[#allocation2 + $0x98] sm:$0xff]  ;;  %v161_v35 = vld [vmem:[%s689_s3 + $0x40] sm:$0xff]  ;;  %v61_v36 = vld [vmem:[#allocation2 + $0x90] sm:$0xff] }
  0x1a   :  { %367 = vmatpush3.msra.mxu0 %v53_v12  ;;  %424 = vmatpush3.msra.mxu1 %v165_v23  ;;  %v46_v34 = vld [vmem:[#allocation2 + $0x18] sm:$0xff]  ;;  %v45_v37 = vld [vmem:[#allocation2 + $0x10] sm:$0xff]  ;;  %v60_v39 = vld [vmem:[#allocation2 + $0x88] sm:$0xff] }
  0x1b   :  { %368 = vmatprep.subr.mxu0 %v68_v13  ;;  %425 = vmatprep.subr.mxu1 %v524_v0  ;;  %v160_v38 = vld [vmem:[%s689_s3 + $0x38] sm:$0xff]  ;;  %v44_v40 = vld [vmem:[#allocation2 + $0x8] sm:$0xff]  ;;  %v159_v41 = vld [vmem:[%s689_s3 + $0x30] sm:$0xff] }
  0x1c   :  { %369 = vmatpush3.msra.mxu0 %v52_v15  ;;  %426 = vmatpush3.msra.mxu1 %v164_v26  ;;  %v59_v42 = vld [vmem:[#allocation2 + $0x80] sm:$0xff]  ;;  %v158_v44 = vld [vmem:[%s689_s3 + $0x28] sm:$0xff]  ;;  %v156_v47 = vld [vmem:[%s689_s3 + $0x18] sm:$0xff] }
  0x1d   :  { %370 = vmatprep.subr.mxu0 %v67_v18  ;;  %427 = vmatprep.subr.mxu1 %v524_v0  ;;  %v43_v43 = vld [vmem:[#allocation2] sm:$0xff]  ;;  %v155_v48 = vld [vmem:[%s689_s3 + $0x10] sm:$0xff]  ;;  %v154_v49 = vld [vmem:[%s689_s3 + $0x8] sm:$0xff] }
  0x1e   :  { %371 = vmatpush3.msra.mxu0 %v51_v19  ;;  %428 = vmatpush3.msra.mxu1 %v163_v29  ;;  %v41_v45 = vld [vmem:[%s686_s0] sm:$0xff]  ;;  %v254_v51 = vld [vmem:[%s691_s5 + $0x38] sm:$0xff]  ;;  %v253_v52 = vld [vmem:[%s691_s5 + $0x30] sm:$0xff] }
  0x1f   :  { %372 = vmatprep.subr.mxu0 %v66_v21  ;;  %429 = vmatprep.subr.mxu1 %v524_v0  ;;  %v157_v46 = vld [vmem:[%s689_s3 + $0x20] sm:$0xff]  ;;  %v252_v53 = vld [vmem:[%s691_s5 + $0x28] sm:$0xff]  ;;  %v250_v55 = vld [vmem:[%s691_s5 + $0x18] sm:$0xff] }
  0x20   :  { %373 = vmatpush3.msra.mxu0 %v50_v22  ;;  %430 = vmatpush3.msra.mxu1 %v162_v32  ;;  %v153_v50 = vld [vmem:[%s689_s3] sm:$0xff]  ;;  %v249_v62 = vld [vmem:[%s691_s5 + $0x10] sm:$0xff]  ;;  %v248_v63 = vld [vmem:[%s691_s5 + $0x8] sm:$0xff] }
  0x21   :  { %374 = vmatprep.subr.mxu0 %v65_v24  ;;  %431 = vmatprep.subr.mxu1 %v524_v0  ;;  %v251_v54 = vld [vmem:[%s691_s5 + $0x20] sm:$0xff] }
  0x22   :  { %375 = vmatpush3.msra.mxu0 %v49_v25  ;;  %432 = vmatpush3.msra.mxu1 %v161_v35  ;;  %v352_v57 = vld [vmem:[%s688_s2] ss:$0 sm:$0xff] }
  0x23   :  { %376 = vmatprep.subr.mxu0 %v64_v27  ;;  %433 = vmatprep.subr.mxu1 %v524_v0  ;;  %v247_v1 = vld [vmem:[%s691_s5] sm:$0xff]  ;;  %s497_s5 = scalar_lea.vmem %s344_s14, 128 }
  0x24   :  { %377 = vmatpush3.msra.mxu0 %v48_v28  ;;  %434 = vmatpush3.msra.mxu1 %v160_v38  ;;  %v353_v2 = vld [vmem:[%s690_s4] ss:$0 sm:$0xff]  ;;  %p498_p5 = scmp.ne.s32.totalorder %s344_s14, %s497_s5  ;;  %p503_p7 = scmp.lt.s32.totalorder %s497_s5, %s497_s5 }
  0x25   :  { %378 = vmatprep.subr.mxu0 %v63_v30  ;;  %435 = vmatprep.subr.mxu1 %v524_v0  ;;  %v354_v7 = vld [vmem:[%s692_s6] ss:$0 sm:$0xff] }
  0x26   :  { %379 = vmatpush3.msra.mxu0 %v47_v31  ;;  %436 = vmatpush3.msra.mxu1 %v159_v41  ;;  %p504_p8 = por %p503_p7, %p502_p6 }
  0x27   :  { %380 = vmatprep.subr.mxu0 %v62_v33  ;;  %437 = vmatprep.subr.mxu1 %v524_v0 }
  0x28   :  { %381 = vmatpush3.msra.mxu0 %v46_v34  ;;  %438 = vmatpush3.msra.mxu1 %v158_v44  ;;  %p505_p9 = pnand %p504_p8, %p498_p5 }
  0x29   :  { %382 = vmatprep.subr.mxu0 %v61_v36  ;;  %439 = vmatprep.subr.mxu1 %v524_v0 }
  0x2a   :  { %383 = vmatpush3.msra.mxu0 %v45_v37  ;;  %440 = vmatpush3.msra.mxu1 %v157_v46 }
  0x2b   :  { %384 = vmatprep.subr.mxu0 %v60_v39  ;;  %441 = vmatprep.subr.mxu1 %v524_v0 }
  0x2c   :  { %385 = vmatpush3.msra.mxu0 %v44_v40  ;;  %442 = vmatpush3.msra.mxu1 %v156_v47 }
  0x2d   :  { %386 = vmatprep.subr.mxu0 %v59_v42  ;;  %443 = vmatprep.subr.mxu1 %v524_v0 }
  0x2e   :  { %387 = vmatpush3.msra.mxu0 %v43_v43  ;;  %444 = vmatpush3.msra.mxu1 %v155_v48 }
  0x2f   :  { %147 = vmatmul.mubr.f32.vlgmr.msra.gmra.mxu0 %v41_v45  ;;  %452 = vmatprep.subr.mxu0 %v524_v0 }
  0x30   :  { %445 = vmatprep.subr.mxu1 %v524_v0  ;;  %468 = vmatprep.mubr.msk.f32.mxu0 %vm525_vm0, %v524_v0 }
  0x31   :  { %446 = vmatpush3.msra.mxu1 %v154_v49  ;;  %453 = vmatpush3.msra.mxu0 %v254_v51 }
  0x32   :  { %447 = vmatprep.subr.mxu1 %v524_v0  ;;  %454 = vmatprep.subr.mxu0 %v524_v0 }
  0x33   :  { %448 = vmatpush3.msra.mxu1 %v153_v50  ;;  %455 = vmatpush3.msra.mxu0 %v253_v52 }
  0x34   :  { %456 = vmatprep.subr.mxu0 %v524_v0 }
  0x35   :  { %457 = vmatpush3.msra.mxu0 %v252_v53 }
  0x36   :  { %458 = vmatprep.subr.mxu0 %v524_v0 }
  0x37   :  { %459 = vmatpush3.msra.mxu0 %v251_v54 }
  0x38   :  { %460 = vmatprep.subr.mxu0 %v524_v0 }
  0x39   :  { %461 = vmatpush3.msra.mxu0 %v250_v55 }
  0x3a   :  { %462 = vmatprep.subr.mxu0 %v524_v0 }
  0x3b   :  { %463 = vmatpush3.msra.mxu0 %v249_v62 }
  0x3c   :  { %464 = vmatprep.subr.mxu0 %v524_v0 }
  0x3d   :  { %465 = vmatpush3.msra.mxu0 %v248_v63 }
  0x3e   :  { %466 = vmatprep.subr.mxu0 %v524_v0 }
  0x3f   :  { %467 = vmatpush3.msra.mxu0 %v247_v1 }
  0xef   :  { %v388_v56 = vpop.f32.mrf.mxu0 }
  0xf1   :  { %v389_v58 = vpop.f32.mrf.mxu0 }
  0xf2   :  { %v390_v59 = vadd.f32 %v389_v58, %v388_v56 }
  0xf4   :  { %v149_v60 = vadd.f32 %v390_v59, %v352_v57 }
  0xf6   :  { %v152_v61 = vmax.f32 %v149_v60, 0.0 }
  0xf8   :  { %450 = vmatmul.mubr.f32.vlgmr.msra.gmra.mxu1 %v152_v61 }
 0x1b8   :  { %v242_v3 = vpop.f32.mrf.mxu1 }
 0x1b9   :  { %v243_v4 = vadd.f32 %v353_v2, %v242_v3 }
 0x1ba   :  { %v451_v5 = vpop.f32.mrf.mxu1 }
 0x1bb   :  { %v246_v6 = vmax.f32 %v243_v4, 0.0 }
 0x1bd   :  { %469 = vmatmul.mubr.msk.f32.vlgmr.msra.gmra.mxu0 %vm262_vm1, %v246_v6 }
 0x27d   :  { %v332_v0 = vpop.f32.mrf.mxu0 }
 0x27e   :  { %v333_v8 = vadd.f32 %v354_v7, %v332_v0 }
 0x27f   :  { %v470_v9 = vpop.f32.mrf.mxu0 }
 0x280   :  { %336 = vst [vmem:[#allocation5] sm:$0xff] %v333_v8 }
 0x281   :  { %508 = shalt.err (!%p505_p9)
}
 0x282   :  { %346 = dma.vmem_to_hbm [thread:$0]  %s344_s14, 128, %s693_s7, [#allocation4]  }
 0x283   :  { %519 = dma.done.wait [#allocation4], 128  }
 0x284   :  { %520 = vsyncadd [#allocation4], 4294967168 }
 0x285   :  { %350 = vsyncpa [#allocation3], 1 }
 0x286   :  { %351 = vsyncpa [#allocation4], 1 }

</bundles_post_ra>
